<compile_context>
chip_gen: v6e
topology: v6e:2x2x1
jax: 0.10.0
libtpu: 0.0.40
codegen_flags: <defaults>
</compile_context>

<pallas_src>
import math
from functools import partial

import jax
import jax.numpy as jnp
from jax.experimental import pallas as pl
from jax.experimental.pallas import tpu as pltpu


# ------------------------------------------------------------------ kernel ---
def cql_kernel(
    x_ref, idx_ref,
    w_enc_ref, b_enc_ref,
    wcat1_ref, bcat1_ref,
    w12_ref, b12_ref, w22_ref, b22_ref,
    whead_ref, bhead_ref,
    qcat_ref, stats_ref,
    *, act_dim, hidden, n_rows, tile_n,
):
    # ---- init the VMEM-resident stats accumulator on the first grid step ----
    @pl.when(pl.program_id(0) == 0)
    def _init():
        stats_ref[...] = jnp.zeros_like(stats_ref)

    x = x_ref[...]                                                    # (T, S) bf16

    # ---- state encoder: Linear(state_dim, d_model) ---------------------------
    emb = jnp.dot(x, w_enc_ref[...], preferred_element_type=jnp.float32) + b_enc_ref[...]

    # ---- fused Q1/Q2 first layer: emb @ [w11 | w21] + [b11 | b21], ReLU ------
    h = jnp.dot(emb.astype(jnp.bfloat16), wcat1_ref[...],
                preferred_element_type=jnp.float32) + bcat1_ref[...]
    h = jnp.maximum(h, 0.0)                                           # (T, 2H) f32

    # hidden is a multiple of 128 -> these slices are whole lane-tiles (free).
    h1 = h[:, :hidden].astype(jnp.bfloat16)
    h2 = h[:, hidden:].astype(jnp.bfloat16)

    # ---- second layers (distinct inputs, kept separate) ----------------------
    h1 = jnp.maximum(
        jnp.dot(h1, w12_ref[...], preferred_element_type=jnp.float32) + b12_ref[...], 0.0)
    h2 = jnp.maximum(
        jnp.dot(h2, w22_ref[...], preferred_element_type=jnp.float32) + b22_ref[...], 0.0)

    # ---- fused heads: block-diagonal (2H, 2A) weight, one matmul, Tanh -------
    hcat = jnp.concatenate([h1, h2], axis=-1).astype(jnp.bfloat16)    # (T, 2H), 128-aligned
    qcat = jnp.tanh(
        jnp.dot(hcat, whead_ref[...], preferred_element_type=jnp.float32) + bhead_ref[...])
    qcat_ref[...] = qcat                                              # (T, 2A) packed q1|q2

    # ---- CQL pieces: gather at taken action + logsumexp, per-column VPU ops --
    idx = idx_ref[...]                                                # (T, 1) int32
    A = act_dim
    valid = (idx >= 0) & (idx <= A - 1)
    safe = jnp.where(valid, idx, jnp.zeros_like(idx))                 # (T, 1)

    q1_cols = [qcat[:, a:a + 1] for a in range(A)]
    q2_cols = [qcat[:, A + a:A + a + 1] for a in range(A)]

    def lse_and_sel(cols):
        m = cols[0]
        for c in cols[1:]:
            m = jnp.maximum(m, c)
        s = jnp.zeros_like(m)
        for c in cols:
            s = s + jnp.exp(c - m)
        lse = m + jnp.log(s)
        sel = jnp.zeros_like(m)
        for a, c in enumerate(cols):
            sel = sel + jnp.where(safe == a, c, 0.0)
        return lse, sel

    lse1, sel1 = lse_and_sel(q1_cols)
    lse2, sel2 = lse_and_sel(q2_cols)

    # mask out padded rows (global row index >= n_rows)
    row = pl.program_id(0) * tile_n + jax.lax.broadcasted_iota(jnp.int32, (tile_n, 1), 0)
    rowmask = (row < n_rows).astype(jnp.float32)                      # (T, 1)

    part = jnp.concatenate([lse1, sel1, lse2, sel2], axis=-1) * rowmask   # (T, 4)
    stats_ref[...] = stats_ref[...] + jnp.sum(part, axis=0, keepdims=True)


# ----------------------------------------------------------------- wrapper ---
def _round_up(x, m):
    return ((x + m - 1) // m) * m


def cql_forward(states, actions, params, *, cql_alpha=1.0, act_dim=3, tile_n_max=256):
    """states: (B, B1, state_dim), actions: (B, B1, 1) integer-valued (mujoco branch)."""
    B, B1, S = states.shape
    N = B * B1
    d_model = params["w_enc"].shape[1]
    hidden = params["w12"].shape[0]
    A = act_dim

    # ---- row tiling / padding -------------------------------------------------
    tile_n = min(tile_n_max, _round_up(max(N, 1), 8))
    num_tiles = pl.cdiv(N, tile_n)
    n_pad = num_tiles * tile_n

    x = states.reshape(N, S).astype(jnp.float32)
    x_pad = jnp.pad(x, ((0, n_pad - N), (0, 0))).astype(jnp.bfloat16)
    idx = actions.reshape(N, 1).astype(jnp.int32)
    idx_pad = jnp.pad(idx, ((0, n_pad - N), (0, 0)))

    # ---- pack weights (layer-1 concat, block-diagonal head), cast to bf16 -----
    w_enc = params["w_enc"].astype(jnp.bfloat16)
    b_enc = params["b_enc"].astype(jnp.float32)
    wcat1 = jnp.concatenate([params["w11"], params["w21"]], axis=1).astype(jnp.bfloat16)
    bcat1 = jnp.concatenate([params["b11"], params["b21"]], axis=1).astype(jnp.float32)
    w12 = params["w12"].astype(jnp.bfloat16)
    b12 = params["b12"].astype(jnp.float32)
    w22 = params["w22"].astype(jnp.bfloat16)
    b22 = params["b22"].astype(jnp.float32)
    wh_bd = jnp.zeros((2 * hidden, 2 * A), jnp.float32)
    wh_bd = wh_bd.at[:hidden, :A].set(params["wh1"])
    wh_bd = wh_bd.at[hidden:, A:].set(params["wh2"])
    whead = wh_bd.astype(jnp.bfloat16)
    bhead = jnp.concatenate([params["bh1"], params["bh2"]], axis=1).astype(jnp.float32)

    kernel_inputs = (x_pad, idx_pad, w_enc, b_enc, wcat1, bcat1,
                     w12, b12, w22, b22, whead, bhead)

    def _const_spec(a):
        return pl.BlockSpec(a.shape, lambda i: (0, 0))

    in_specs = [
        pl.BlockSpec((tile_n, S), lambda i: (i, 0)),
        pl.BlockSpec((tile_n, 1), lambda i: (i, 0)),
        _const_spec(w_enc), _const_spec(b_enc),
        _const_spec(wcat1), _const_spec(bcat1),
        _const_spec(w12), _const_spec(b12),
        _const_spec(w22), _const_spec(b22),
        _const_spec(whead), _const_spec(bhead),
    ]
    out_specs = (
        pl.BlockSpec((tile_n, 2 * A), lambda i: (i, 0)),
        pl.BlockSpec((1, 4), lambda i: (0, 0)),
    )
    out_shape = (
        jax.ShapeDtypeStruct((n_pad, 2 * A), jnp.float32),
        jax.ShapeDtypeStruct((1, 4), jnp.float32),
    )

    flops = 2 * n_pad * (S * d_model + d_model * 2 * hidden
                         + 2 * hidden * hidden + 2 * hidden * 2 * A)
    transcendentals = n_pad * (2 * A + 2 * A + 2)          # exp + tanh + log
    bytes_accessed = (sum(int(a.size) * a.dtype.itemsize for a in kernel_inputs)
                      + n_pad * 2 * A * 4 + 16)

    kernel = partial(cql_kernel, act_dim=A, hidden=hidden, n_rows=N, tile_n=tile_n)

    qcat, stats = pl.pallas_call(
        kernel,
        out_shape=out_shape,
        grid_spec=pltpu.PrefetchScalarGridSpec(
            num_scalar_prefetch=0,
            grid=(num_tiles,),
            in_specs=in_specs,
            out_specs=out_specs,
        ),
        compiler_params=pltpu.CompilerParams(
            # stats output is an accumulator revisited on every step -> "arbitrary".
            dimension_semantics=("arbitrary",),
        ),
        cost_estimate=pl.CostEstimate(
            flops=int(flops),
            transcendentals=int(transcendentals),
            bytes_accessed=int(bytes_accessed),
        ),
    )(*kernel_inputs)

    q1_value = qcat[:N, :A].reshape(B, B1, A)
    q2_value = qcat[:N, A:].reshape(B, B1, A)

    # mask = ones((B, B1, 1)) (padding_idx is None) -> valid_count = N
    inv_n = 1.0 / float(N)
    cql_q1 = (stats[0, 0] - stats[0, 1]) * inv_n
    cql_q2 = (stats[0, 2] - stats[0, 3]) * inv_n
    cql_loss = (cql_q1 + cql_q2) * cql_alpha

    return {
        "logits": q1_value,
        "q1_value": q1_value,
        "q2_value": q2_value,
        "cql_loss": cql_loss,
        "new_mems": None,
        "mem_tokens": None,
        "hidden": None,
    }


# --------------------------------------------------------- pure-JAX reference ---
def cql_forward_ref(states, actions, params, *, cql_alpha=1.0, act_dim=3):
    """Reference path mirroring the kernel's bf16-for-matmul / f32-elsewhere recipe."""
    B, B1, S = states.shape
    N = B * B1
    A = act_dim
    bf = lambda a: a.astype(jnp.bfloat16).astype(jnp.float32)

    x = states.reshape(N, S).astype(jnp.float32)
    idx = actions.reshape(N).astype(jnp.int32)

    emb = bf(x) @ bf(params["w_enc"]) + params["b_enc"]
    h1 = jax.nn.relu(bf(emb) @ bf(params["w11"]) + params["b11"])
    h2 = jax.nn.relu(bf(emb) @ bf(params["w21"]) + params["b21"])
    h1 = jax.nn.relu(bf(h1) @ bf(params["w12"]) + params["b12"])
    h2 = jax.nn.relu(bf(h2) @ bf(params["w22"]) + params["b22"])
    q1 = jnp.tanh(bf(h1) @ bf(params["wh1"]) + params["bh1"])
    q2 = jnp.tanh(bf(h2) @ bf(params["wh2"]) + params["bh2"])

    valid = (idx >= 0) & (idx <= A - 1)
    safe = jnp.where(valid, idx, 0)
    sel1 = jnp.take_along_axis(q1, safe[:, None], axis=-1)[:, 0]
    sel2 = jnp.take_along_axis(q2, safe[:, None], axis=-1)[:, 0]
    lse1 = jax.nn.logsumexp(q1, axis=-1)
    lse2 = jax.nn.logsumexp(q2, axis=-1)
    cql = ((jnp.mean(lse1) - jnp.mean(sel1)) + (jnp.mean(lse2) - jnp.mean(sel2))) * cql_alpha
    return q1.reshape(B, B1, A), q2.reshape(B, B1, A), cql


# ------------------------------------------------------------- param setup ---
def _linear_init(key, fan_in, fan_out):
    """PyTorch nn.Linear default init, weight stored as (in, out), bias as (1, out)."""
    kw, kb = jax.random.split(key)
    bound = 1.0 / math.sqrt(fan_in)
    w = jax.random.uniform(kw, (fan_in, fan_out), jnp.float32, -bound, bound)
    b = jax.random.uniform(kb, (1, fan_out), jnp.float32, -bound, bound)
    return w, b


def init_params(key, state_dim, d_model, hidden, act_dim):
    keys = jax.random.split(key, 7)
    p = {}
    p["w_enc"], p["b_enc"] = _linear_init(keys[0], state_dim, d_model)
    p["w11"], p["b11"] = _linear_init(keys[1], d_model, hidden)
    p["w12"], p["b12"] = _linear_init(keys[2], hidden, hidden)
    p["wh1"], p["bh1"] = _linear_init(keys[3], hidden, act_dim)
    p["w21"], p["b21"] = _linear_init(keys[4], d_model, hidden)
    p["w22"], p["b22"] = _linear_init(keys[5], hidden, hidden)
    p["wh2"], p["bh2"] = _linear_init(keys[6], hidden, act_dim)
    return p


# -------------------------------------------------------------------- main ---
if __name__ == "__main__":
    state_dim = 11          # mujoco-style flat observation
    d_model = 25
    hidden = 256
    act_dim = 3
    cql_alpha = 1.0

    key = jax.random.PRNGKey(0)
    k_params, k_s1, k_a1, k_s2, k_a2 = jax.random.split(key, 5)
    params = init_params(k_params, state_dim, d_model, hidden, act_dim)

    fwd = jax.jit(partial(cql_forward, cql_alpha=cql_alpha, act_dim=act_dim))

    def check(states, actions):
        out = fwd(states, actions, params)
        jax.block_until_ready(out["q1_value"])
        jax.block_until_ready(out["q2_value"])
        jax.block_until_ready(out["cql_loss"])
        q1_ref, q2_ref, cql_ref = cql_forward_ref(
            states, actions, params, cql_alpha=cql_alpha, act_dim=act_dim)
        assert out["q1_value"].shape == q1_ref.shape
        assert out["q2_value"].shape == q2_ref.shape
        assert out["cql_loss"].shape == ()
        assert bool(jnp.isfinite(out["cql_loss"]))
        assert jnp.allclose(out["q1_value"], q1_ref, atol=2e-3, rtol=2e-3)
        assert jnp.allclose(out["q2_value"], q2_ref, atol=2e-3, rtol=2e-3)
        assert jnp.allclose(out["cql_loss"], cql_ref, atol=2e-3, rtol=2e-3)

    # small case (single tile): B=2, B1=8
    B, B1 = 2, 8
    states = jax.random.normal(k_s1, (B, B1, state_dim), dtype=jnp.float32)
    actions = jax.random.randint(k_a1, (B, B1, 1), 0, act_dim).astype(jnp.float32)
    check(states, actions)

    # larger case exercising the multi-tile grid + row-padding mask: N = 400 -> 2 tiles of 256
    B, B1 = 2, 200
    states = jax.random.normal(k_s2, (B, B1, state_dim), dtype=jnp.float32)
    actions = jax.random.randint(k_a2, (B, B1, 1), 0, act_dim).astype(jnp.float32)
    check(states, actions)

    print("KERNEL_OK")
</pallas_src>

<mosaic_0001>
module attributes {stable_mosaic.version = 11 : i64} {
  func.func @cql_kernel(%arg0: i32, %arg1: memref<16x11xbf16, #tpu.memory_space<vmem>>, %arg2: memref<16x1xi32, #tpu.memory_space<vmem>>, %arg3: memref<11x25xbf16, #tpu.memory_space<vmem>>, %arg4: memref<1x25xf32, #tpu.memory_space<vmem>>, %arg5: memref<25x512xbf16, #tpu.memory_space<vmem>>, %arg6: memref<1x512xf32, #tpu.memory_space<vmem>>, %arg7: memref<256x256xbf16, #tpu.memory_space<vmem>>, %arg8: memref<1x256xf32, #tpu.memory_space<vmem>>, %arg9: memref<256x256xbf16, #tpu.memory_space<vmem>>, %arg10: memref<1x256xf32, #tpu.memory_space<vmem>>, %arg11: memref<512x6xbf16, #tpu.memory_space<vmem>>, %arg12: memref<1x6xf32, #tpu.memory_space<vmem>>, %arg13: memref<16x6xf32, #tpu.memory_space<vmem>>, %arg14: memref<1x4xf32, #tpu.memory_space<vmem>>) attributes {dimension_semantics = [#tpu.dimension_semantics<arbitrary>], iteration_bounds = array<i64: 1>, scalar_prefetch = 0 : i64, scratch_operands = 0 : i64, tpu.core_type = #tpu.core_type<tc>, window_params = [{transform_indices = @transform_0, window_bounds = array<i64: 16, 11>}, {transform_indices = @transform_1, window_bounds = array<i64: 16, 1>}, {pipeline_mode = #tpu.pipeline_mode<synchronous>, transform_indices = @transform_2, window_bounds = array<i64: 11, 25>}, {pipeline_mode = #tpu.pipeline_mode<synchronous>, transform_indices = @transform_3, window_bounds = array<i64: 1, 25>}, {pipeline_mode = #tpu.pipeline_mode<synchronous>, transform_indices = @transform_4, window_bounds = array<i64: 25, 512>}, {pipeline_mode = #tpu.pipeline_mode<synchronous>, transform_indices = @transform_5, window_bounds = array<i64: 1, 512>}, {pipeline_mode = #tpu.pipeline_mode<synchronous>, transform_indices = @transform_6, window_bounds = array<i64: 256, 256>}, {pipeline_mode = #tpu.pipeline_mode<synchronous>, transform_indices = @transform_7, window_bounds = array<i64: 1, 256>}, {pipeline_mode = #tpu.pipeline_mode<synchronous>, transform_indices = @transform_8, window_bounds = array<i64: 256, 256>}, {pipeline_mode = #tpu.pipeline_mode<synchronous>, transform_indices = @transform_9, window_bounds = array<i64: 1, 256>}, {pipeline_mode = #tpu.pipeline_mode<synchronous>, transform_indices = @transform_10, window_bounds = array<i64: 512, 6>}, {pipeline_mode = #tpu.pipeline_mode<synchronous>, transform_indices = @transform_11, window_bounds = array<i64: 1, 6>}, {transform_indices = @transform_12, window_bounds = array<i64: 16, 6>}, {pipeline_mode = #tpu.pipeline_mode<synchronous>, transform_indices = @transform_13, window_bounds = array<i64: 1, 4>}]} {
    %c0_i32 = arith.constant 0 : i32
    %0 = arith.cmpi eq, %arg0, %c0_i32 : i32
    %1 = arith.extui %0 : i1 to i32
    %c0_i32_0 = arith.constant 0 : i32
    %2 = arith.cmpi ne, %1, %c0_i32_0 : i32
    scf.if %2 {
      %cst_56 = arith.constant 0.000000e+00 : f32
      %134 = vector.broadcast %cst_56 : f32 to vector<1x4xf32>
      %c0_57 = arith.constant 0 : index
      %c0_58 = arith.constant 0 : index
      %135 = vector.load %arg14[%c0_57, %c0_58] : memref<1x4xf32, #tpu.memory_space<vmem>>, vector<1x4xf32>
      tpu.vector_store %arg14[%c0_57, %c0_58], %134 {strides = array<i32>} : memref<1x4xf32, #tpu.memory_space<vmem>>, vector<1x4xf32>,
    } else {
    }
    %c0 = arith.constant 0 : index
    %c0_1 = arith.constant 0 : index
    %3 = vector.load %arg1[%c0, %c0_1] : memref<16x11xbf16, #tpu.memory_space<vmem>>, vector<16x11xbf16>
    %c0_2 = arith.constant 0 : index
    %c0_3 = arith.constant 0 : index
    %4 = vector.load %arg3[%c0_2, %c0_3] : memref<11x25xbf16, #tpu.memory_space<vmem>>, vector<11x25xbf16>
    %cst = arith.constant dense<0.000000e+00> : vector<16x25xf32>
    %5 = tpu.matmul %3, %4, %cst {dimension_numbers = #tpu.dot_dimension_numbers<[1], [0], [0], [1], [0, 0, 1, 1], [], []>} : vector<16x11xbf16>, vector<11x25xbf16>, vector<16x25xf32> -> vector<16x25xf32>
    %c0_4 = arith.constant 0 : index
    %c0_5 = arith.constant 0 : index
    %6 = vector.load %arg4[%c0_4, %c0_5] : memref<1x25xf32, #tpu.memory_space<vmem>>, vector<1x25xf32>
    %7 = vector.broadcast %6 : vector<1x25xf32> to vector<16x25xf32>
    %8 = arith.addf %5, %7 : vector<16x25xf32>
    %9 = arith.truncf %8 : vector<16x25xf32> to vector<16x25xbf16>
    %c0_6 = arith.constant 0 : index
    %c0_7 = arith.constant 0 : index
    %10 = vector.load %arg5[%c0_6, %c0_7] : memref<25x512xbf16, #tpu.memory_space<vmem>>, vector<25x512xbf16>
    %cst_8 = arith.constant dense<0.000000e+00> : vector<16x512xf32>
    %11 = tpu.matmul %9, %10, %cst_8 {dimension_numbers = #tpu.dot_dimension_numbers<[1], [0], [0], [1], [0, 0, 1, 1], [], []>} : vector<16x25xbf16>, vector<25x512xbf16>, vector<16x512xf32> -> vector<16x512xf32>
    %c0_9 = arith.constant 0 : index
    %c0_10 = arith.constant 0 : index
    %12 = vector.load %arg6[%c0_9, %c0_10] : memref<1x512xf32, #tpu.memory_space<vmem>>, vector<1x512xf32>
    %13 = vector.broadcast %12 : vector<1x512xf32> to vector<16x512xf32>
    %14 = arith.addf %11, %13 : vector<16x512xf32>
    %cst_11 = arith.constant 0.000000e+00 : f32
    %15 = vector.broadcast %cst_11 : f32 to vector<16x512xf32>
    %16 = arith.maximumf %14, %15 : vector<16x512xf32>
    %17 = vector.extract_strided_slice %16 {offsets = [0, 0], sizes = [16, 256], strides = [1, 1]} : vector<16x512xf32> to vector<16x256xf32>
    %18 = arith.truncf %17 : vector<16x256xf32> to vector<16x256xbf16>
    %19 = vector.extract_strided_slice %16 {offsets = [0, 256], sizes = [16, 256], strides = [1, 1]} : vector<16x512xf32> to vector<16x256xf32>
    %20 = arith.truncf %19 : vector<16x256xf32> to vector<16x256xbf16>
    %c0_12 = arith.constant 0 : index
    %c0_13 = arith.constant 0 : index
    %21 = vector.load %arg7[%c0_12, %c0_13] : memref<256x256xbf16, #tpu.memory_space<vmem>>, vector<256x256xbf16>
    %cst_14 = arith.constant dense<0.000000e+00> : vector<16x256xf32>
    %22 = tpu.matmul %18, %21, %cst_14 {dimension_numbers = #tpu.dot_dimension_numbers<[1], [0], [0], [1], [0, 0, 1, 1], [], []>} : vector<16x256xbf16>, vector<256x256xbf16>, vector<16x256xf32> -> vector<16x256xf32>
    %c0_15 = arith.constant 0 : index
    %c0_16 = arith.constant 0 : index
    %23 = vector.load %arg8[%c0_15, %c0_16] : memref<1x256xf32, #tpu.memory_space<vmem>>, vector<1x256xf32>
    %24 = vector.broadcast %23 : vector<1x256xf32> to vector<16x256xf32>
    %25 = arith.addf %22, %24 : vector<16x256xf32>
    %cst_17 = arith.constant 0.000000e+00 : f32
    %26 = vector.broadcast %cst_17 : f32 to vector<16x256xf32>
    %27 = arith.maximumf %25, %26 : vector<16x256xf32>
    %c0_18 = arith.constant 0 : index
    %c0_19 = arith.constant 0 : index
    %28 = vector.load %arg9[%c0_18, %c0_19] : memref<256x256xbf16, #tpu.memory_space<vmem>>, vector<256x256xbf16>
    %cst_20 = arith.constant dense<0.000000e+00> : vector<16x256xf32>
    %29 = tpu.matmul %20, %28, %cst_20 {dimension_numbers = #tpu.dot_dimension_numbers<[1], [0], [0], [1], [0, 0, 1, 1], [], []>} : vector<16x256xbf16>, vector<256x256xbf16>, vector<16x256xf32> -> vector<16x256xf32>
    %c0_21 = arith.constant 0 : index
    %c0_22 = arith.constant 0 : index
    %30 = vector.load %arg10[%c0_21, %c0_22] : memref<1x256xf32, #tpu.memory_space<vmem>>, vector<1x256xf32>
    %31 = vector.broadcast %30 : vector<1x256xf32> to vector<16x256xf32>
    %32 = arith.addf %29, %31 : vector<16x256xf32>
    %cst_23 = arith.constant 0.000000e+00 : f32
    %33 = vector.broadcast %cst_23 : f32 to vector<16x256xf32>
    %34 = arith.maximumf %32, %33 : vector<16x256xf32>
    %35 = tpu.concatenate %27, %34 in 1 : vector<16x256xf32>, vector<16x256xf32> -> vector<16x512xf32>
    %36 = arith.truncf %35 : vector<16x512xf32> to vector<16x512xbf16>
    %c0_24 = arith.constant 0 : index
    %c0_25 = arith.constant 0 : index
    %37 = vector.load %arg11[%c0_24, %c0_25] : memref<512x6xbf16, #tpu.memory_space<vmem>>, vector<512x6xbf16>
    %cst_26 = arith.constant dense<0.000000e+00> : vector<16x6xf32>
    %38 = tpu.matmul %36, %37, %cst_26 {dimension_numbers = #tpu.dot_dimension_numbers<[1], [0], [0], [1], [0, 0, 1, 1], [], []>} : vector<16x512xbf16>, vector<512x6xbf16>, vector<16x6xf32> -> vector<16x6xf32>
    %c0_27 = arith.constant 0 : index
    %c0_28 = arith.constant 0 : index
    %39 = vector.load %arg12[%c0_27, %c0_28] : memref<1x6xf32, #tpu.memory_space<vmem>>, vector<1x6xf32>
    %40 = vector.broadcast %39 : vector<1x6xf32> to vector<16x6xf32>
    %41 = arith.addf %38, %40 : vector<16x6xf32>
    %42 = math.tanh %41 : vector<16x6xf32>
    %c0_29 = arith.constant 0 : index
    %c0_30 = arith.constant 0 : index
    %43 = vector.load %arg13[%c0_29, %c0_30] : memref<16x6xf32, #tpu.memory_space<vmem>>, vector<16x6xf32>
    tpu.vector_store %arg13[%c0_29, %c0_30], %42 {strides = array<i32>} : memref<16x6xf32, #tpu.memory_space<vmem>>, vector<16x6xf32>,
    %c0_31 = arith.constant 0 : index
    %c0_32 = arith.constant 0 : index
    %44 = vector.load %arg2[%c0_31, %c0_32] : memref<16x1xi32, #tpu.memory_space<vmem>>, vector<16x1xi32>
    %c0_i32_33 = arith.constant 0 : i32
    %45 = vector.broadcast %c0_i32_33 : i32 to vector<16x1xi32>
    %46 = arith.cmpi sge, %44, %45 : vector<16x1xi32>
    %c2_i32 = arith.constant 2 : i32
    %47 = vector.broadcast %c2_i32 : i32 to vector<16x1xi32>
    %48 = arith.cmpi sle, %44, %47 : vector<16x1xi32>
    %49 = arith.andi %46, %48 : vector<16x1xi1>
    %c0_i32_34 = arith.constant 0 : i32
    %50 = vector.broadcast %c0_i32_34 : i32 to vector<16x1xi32>
    %51 = arith.select %49, %44, %50 : vector<16x1xi1>, vector<16x1xi32>
    %52 = vector.extract_strided_slice %42 {offsets = [0, 0], sizes = [16, 1], strides = [1, 1]} : vector<16x6xf32> to vector<16x1xf32>
    %53 = vector.extract_strided_slice %42 {offsets = [0, 1], sizes = [16, 1], strides = [1, 1]} : vector<16x6xf32> to vector<16x1xf32>
    %54 = vector.extract_strided_slice %42 {offsets = [0, 2], sizes = [16, 1], strides = [1, 1]} : vector<16x6xf32> to vector<16x1xf32>
    %55 = vector.extract_strided_slice %42 {offsets = [0, 3], sizes = [16, 1], strides = [1, 1]} : vector<16x6xf32> to vector<16x1xf32>
    %56 = vector.extract_strided_slice %42 {offsets = [0, 4], sizes = [16, 1], strides = [1, 1]} : vector<16x6xf32> to vector<16x1xf32>
    %57 = vector.extract_strided_slice %42 {offsets = [0, 5], sizes = [16, 1], strides = [1, 1]} : vector<16x6xf32> to vector<16x1xf32>
    %58 = arith.maximumf %52, %53 : vector<16x1xf32>
    %59 = arith.maximumf %58, %54 : vector<16x1xf32>
    %cst_35 = arith.constant 0.000000e+00 : f32
    %60 = vector.broadcast %cst_35 : f32 to vector<16x1xf32>
    %61 = arith.subf %52, %59 : vector<16x1xf32>
    %62 = math.exp %61 : vector<16x1xf32>
    %63 = arith.addf %60, %62 : vector<16x1xf32>
    %64 = arith.subf %53, %59 : vector<16x1xf32>
    %65 = math.exp %64 : vector<16x1xf32>
    %66 = arith.addf %63, %65 : vector<16x1xf32>
    %67 = arith.subf %54, %59 : vector<16x1xf32>
    %68 = math.exp %67 : vector<16x1xf32>
    %69 = arith.addf %66, %68 : vector<16x1xf32>
    %70 = math.log %69 : vector<16x1xf32>
    %71 = arith.addf %59, %70 : vector<16x1xf32>
    %cst_36 = arith.constant 0.000000e+00 : f32
    %72 = vector.broadcast %cst_36 : f32 to vector<16x1xf32>
    %c0_i32_37 = arith.constant 0 : i32
    %73 = vector.broadcast %c0_i32_37 : i32 to vector<16x1xi32>
    %74 = arith.cmpi eq, %51, %73 : vector<16x1xi32>
    %cst_38 = arith.constant 0.000000e+00 : f32
    %75 = vector.broadcast %cst_38 : f32 to vector<16x1xf32>
    %76 = arith.select %74, %52, %75 : vector<16x1xi1>, vector<16x1xf32>
    %77 = arith.addf %72, %76 : vector<16x1xf32>
    %c1_i32 = arith.constant 1 : i32
    %78 = vector.broadcast %c1_i32 : i32 to vector<16x1xi32>
    %79 = arith.cmpi eq, %51, %78 : vector<16x1xi32>
    %cst_39 = arith.constant 0.000000e+00 : f32
    %80 = vector.broadcast %cst_39 : f32 to vector<16x1xf32>
    %81 = arith.select %79, %53, %80 : vector<16x1xi1>, vector<16x1xf32>
    %82 = arith.addf %77, %81 : vector<16x1xf32>
    %c2_i32_40 = arith.constant 2 : i32
    %83 = vector.broadcast %c2_i32_40 : i32 to vector<16x1xi32>
    %84 = arith.cmpi eq, %51, %83 : vector<16x1xi32>
    %cst_41 = arith.constant 0.000000e+00 : f32
    %85 = vector.broadcast %cst_41 : f32 to vector<16x1xf32>
    %86 = arith.select %84, %54, %85 : vector<16x1xi1>, vector<16x1xf32>
    %87 = arith.addf %82, %86 : vector<16x1xf32>
    %88 = arith.maximumf %55, %56 : vector<16x1xf32>
    %89 = arith.maximumf %88, %57 : vector<16x1xf32>
    %cst_42 = arith.constant 0.000000e+00 : f32
    %90 = vector.broadcast %cst_42 : f32 to vector<16x1xf32>
    %91 = arith.subf %55, %89 : vector<16x1xf32>
    %92 = math.exp %91 : vector<16x1xf32>
    %93 = arith.addf %90, %92 : vector<16x1xf32>
    %94 = arith.subf %56, %89 : vector<16x1xf32>
    %95 = math.exp %94 : vector<16x1xf32>
    %96 = arith.addf %93, %95 : vector<16x1xf32>
    %97 = arith.subf %57, %89 : vector<16x1xf32>
    %98 = math.exp %97 : vector<16x1xf32>
    %99 = arith.addf %96, %98 : vector<16x1xf32>
    %100 = math.log %99 : vector<16x1xf32>
    %101 = arith.addf %89, %100 : vector<16x1xf32>
    %cst_43 = arith.constant 0.000000e+00 : f32
    %102 = vector.broadcast %cst_43 : f32 to vector<16x1xf32>
    %c0_i32_44 = arith.constant 0 : i32
    %103 = vector.broadcast %c0_i32_44 : i32 to vector<16x1xi32>
    %104 = arith.cmpi eq, %51, %103 : vector<16x1xi32>
    %cst_45 = arith.constant 0.000000e+00 : f32
    %105 = vector.broadcast %cst_45 : f32 to vector<16x1xf32>
    %106 = arith.select %104, %55, %105 : vector<16x1xi1>, vector<16x1xf32>
    %107 = arith.addf %102, %106 : vector<16x1xf32>
    %c1_i32_46 = arith.constant 1 : i32
    %108 = vector.broadcast %c1_i32_46 : i32 to vector<16x1xi32>
    %109 = arith.cmpi eq, %51, %108 : vector<16x1xi32>
    %cst_47 = arith.constant 0.000000e+00 : f32
    %110 = vector.broadcast %cst_47 : f32 to vector<16x1xf32>
    %111 = arith.select %109, %56, %110 : vector<16x1xi1>, vector<16x1xf32>
    %112 = arith.addf %107, %111 : vector<16x1xf32>
    %c2_i32_48 = arith.constant 2 : i32
    %113 = vector.broadcast %c2_i32_48 : i32 to vector<16x1xi32>
    %114 = arith.cmpi eq, %51, %113 : vector<16x1xi32>
    %cst_49 = arith.constant 0.000000e+00 : f32
    %115 = vector.broadcast %cst_49 : f32 to vector<16x1xf32>
    %116 = arith.select %114, %57, %115 : vector<16x1xi1>, vector<16x1xf32>
    %117 = arith.addf %112, %116 : vector<16x1xf32>
    %c16_i32 = arith.constant 16 : i32
    %118 = arith.muli %arg0, %c16_i32 : i32
    %119 = tpu.iota {dimensions = array<i32: 0>} : vector<16x1xi32>
    %120 = vector.broadcast %118 : i32 to vector<16x1xi32>
    %121 = arith.addi %120, %119 : vector<16x1xi32>
    %c16_i32_50 = arith.constant 16 : i32
    %122 = vector.broadcast %c16_i32_50 : i32 to vector<16x1xi32>
    %123 = arith.cmpi slt, %121, %122 : vector<16x1xi32>
    %124 = arith.extui %123 : vector<16x1xi1> to vector<16x1xi32>
    %125 = arith.sitofp %124 : vector<16x1xi32> to vector<16x1xf32>
    %126 = tpu.concatenate %71, %87, %101, %117 in 1 : vector<16x1xf32>, vector<16x1xf32>, vector<16x1xf32>, vector<16x1xf32> -> vector<16x4xf32>
    %127 = vector.broadcast %125 : vector<16x1xf32> to vector<16x4xf32>
    %128 = arith.mulf %126, %127 : vector<16x4xf32>
    %c0_51 = arith.constant 0 : index
    %c0_52 = arith.constant 0 : index
    %129 = vector.load %arg14[%c0_51, %c0_52] : memref<1x4xf32, #tpu.memory_space<vmem>>, vector<1x4xf32>
    %cst_53 = arith.constant dense<0.000000e+00> : vector<4xf32>
    %130 = vector.multi_reduction <add>, %128, %cst_53 [0] : vector<16x4xf32> to vector<4xf32>
    %131 = vector.shape_cast %130 : vector<4xf32> to vector<1x4xf32>
    %132 = arith.addf %129, %131 : vector<1x4xf32>
    %c0_54 = arith.constant 0 : index
    %c0_55 = arith.constant 0 : index
    %133 = vector.load %arg14[%c0_54, %c0_55] : memref<1x4xf32, #tpu.memory_space<vmem>>, vector<1x4xf32>
    tpu.vector_store %arg14[%c0_54, %c0_55], %132 {strides = array<i32>} : memref<1x4xf32, #tpu.memory_space<vmem>>, vector<1x4xf32>,
    return
  }
  func.func @transform_0(%arg0: i32) -> (i32, i32) {
    %c0_i32 = arith.constant 0 : i32
    %c0_i32_0 = arith.constant 0 : i32
    return %arg0, %c0_i32 : i32, i32
  }
  func.func @transform_1(%arg0: i32) -> (i32, i32) {
    %c0_i32 = arith.constant 0 : i32
    %c0_i32_0 = arith.constant 0 : i32
    return %arg0, %c0_i32 : i32, i32
  }
  func.func @transform_2(%arg0: i32) -> (i32, i32) {
    %c0_i32 = arith.constant 0 : i32
    %c0_i32_0 = arith.constant 0 : i32
    %c0_i32_1 = arith.constant 0 : i32
    return %c0_i32, %c0_i32_0 : i32, i32
  }
  func.func @transform_3(%arg0: i32) -> (i32, i32) {
    %c0_i32 = arith.constant 0 : i32
    %c0_i32_0 = arith.constant 0 : i32
    %c0_i32_1 = arith.constant 0 : i32
    return %c0_i32, %c0_i32_0 : i32, i32
  }
  func.func @transform_4(%arg0: i32) -> (i32, i32) {
    %c0_i32 = arith.constant 0 : i32
    %c0_i32_0 = arith.constant 0 : i32
    %c0_i32_1 = arith.constant 0 : i32
    return %c0_i32, %c0_i32_0 : i32, i32
  }
  func.func @transform_5(%arg0: i32) -> (i32, i32) {
    %c0_i32 = arith.constant 0 : i32
    %c0_i32_0 = arith.constant 0 : i32
    %c0_i32_1 = arith.constant 0 : i32
    return %c0_i32, %c0_i32_0 : i32, i32
  }
  func.func @transform_6(%arg0: i32) -> (i32, i32) {
    %c0_i32 = arith.constant 0 : i32
    %c0_i32_0 = arith.constant 0 : i32
    %c0_i32_1 = arith.constant 0 : i32
    return %c0_i32, %c0_i32_0 : i32, i32
  }
  func.func @transform_7(%arg0: i32) -> (i32, i32) {
    %c0_i32 = arith.constant 0 : i32
    %c0_i32_0 = arith.constant 0 : i32
    %c0_i32_1 = arith.constant 0 : i32
    return %c0_i32, %c0_i32_0 : i32, i32
  }
  func.func @transform_8(%arg0: i32) -> (i32, i32) {
    %c0_i32 = arith.constant 0 : i32
    %c0_i32_0 = arith.constant 0 : i32
    %c0_i32_1 = arith.constant 0 : i32
    return %c0_i32, %c0_i32_0 : i32, i32
  }
  func.func @transform_9(%arg0: i32) -> (i32, i32) {
    %c0_i32 = arith.constant 0 : i32
    %c0_i32_0 = arith.constant 0 : i32
    %c0_i32_1 = arith.constant 0 : i32
    return %c0_i32, %c0_i32_0 : i32, i32
  }
  func.func @transform_10(%arg0: i32) -> (i32, i32) {
    %c0_i32 = arith.constant 0 : i32
    %c0_i32_0 = arith.constant 0 : i32
    %c0_i32_1 = arith.constant 0 : i32
    return %c0_i32, %c0_i32_0 : i32, i32
  }
  func.func @transform_11(%arg0: i32) -> (i32, i32) {
    %c0_i32 = arith.constant 0 : i32
    %c0_i32_0 = arith.constant 0 : i32
    %c0_i32_1 = arith.constant 0 : i32
    return %c0_i32, %c0_i32_0 : i32, i32
  }
  func.func @transform_12(%arg0: i32) -> (i32, i32) {
    %c0_i32 = arith.constant 0 : i32
    %c0_i32_0 = arith.constant 0 : i32
    return %arg0, %c0_i32 : i32, i32
  }
  func.func @transform_13(%arg0: i32) -> (i32, i32) {
    %c0_i32 = arith.constant 0 : i32
    %c0_i32_0 = arith.constant 0 : i32
    %c0_i32_1 = arith.constant 0 : i32
    return %c0_i32, %c0_i32_0 : i32, i32
  }
}

</mosaic_0001>

<bundles_post_ra>
// kernel: cql_forward.1
= control target key start
LH: loop header
LB: loop body
LE: loop exit
PB: predicated region body
PF: predicated region fallthrough
CT: control target
= control target key end

     0   :  { %vm48_vm0 = vcmask 24576   ;;  %vm75_vm1 = vcmask 1044480   ;;  %vm76_vm2 = vcmask 1045504   ;;  %v1706_v0 = vmov 0.0   ;;  %s1710_s30 = smov 126   ;;  %s1711_s14 = smov 127   ;;  %s2231_s13 = inlined_call_operand.vmem [shape: f32[1,4], index: 13, kind: output, shape index: {1}]   ;;  %s2232_s2 = inlined_call_operand.vmem [shape: bf16[11,25], index: 2, kind: input, shape index: {}]   ;;  %s2233_s0 = inlined_call_operand.vmem [shape: bf16[16,11], index: 0, kind: input, shape index: {}]   ;;  %s2234_s4 = inlined_call_operand.vmem [shape: bf16[25,512], index: 4, kind: input, shape index: {}]   ;;  %s2235_s6 = inlined_call_operand.vmem [shape: bf16[256,256], index: 6, kind: input, shape index: {}]   ;;  %s2236_s8 = inlined_call_operand.vmem [shape: bf16[256,256], index: 8, kind: input, shape index: {}]   ;;  %s2237_s3 = inlined_call_operand.vmem [shape: f32[1,25], index: 3, kind: input, shape index: {}]   ;;  %s2238_s10 = inlined_call_operand.vmem [shape: bf16[512,6], index: 10, kind: input, shape index: {}]   ;;  %s2239_s5 = inlined_call_operand.vmem [shape: f32[1,512], index: 5, kind: input, shape index: {}]   ;;  %s2240_s7 = inlined_call_operand.vmem [shape: f32[1,256], index: 7, kind: input, shape index: {}]   ;;  %s2241_s9 = inlined_call_operand.vmem [shape: f32[1,256], index: 9, kind: input, shape index: {}]   ;;  %s2242_s11 = inlined_call_operand.vmem [shape: f32[1,6], index: 11, kind: input, shape index: {}]   ;;  %s2243_s12 = inlined_call_operand.vmem [shape: f32[16,6], index: 12, kind: output, shape index: {0}]   ;;  %s2244_s1 = inlined_call_operand.vmem [shape: s32[16,1], index: 1, kind: input, shape index: {}]  }
   0x1   :  { %49 = vst.msk [vmem:[%s2231_s13] sm:$0x1] %vm48_vm0, %v1706_v0  ;;  %1526 = vmatprep.subr.bf16.mxu0 %v1706_v0  ;;  %v1544_v1 = vld [vmem:[%s2232_s2] sm:$0x3f]   ;;  %v1707_v2 = vmov 65535   ;;  %vm1708_vm3 = vmmov 0  }
   0x2   :  { %v77_v3 = vsel %vm75_vm1, 4294967295, %v1707_v2  ;;  %1528 = vmatprep.mubr.msk.bf16.mxu0 %vm1708_vm3, %v1706_v0  ;;  %v1545_v6 = vld [vmem:[%s2233_s0] sm:$0xff]   ;;  %vm71_vm4 = vcmask 89088   ;;  %vm194_vm5 = vcmask 1043456   ;;  %v1556_v18 = vld [vmem:[%s2234_s4 + $0xc] ss:$16 sps:$4 sm:$0xff]  }
   0x3   :  { %v78_v4 = vsel %vm76_vm2, %v77_v3, 0  ;;  %v1546_v7 = vld [vmem:[%s2234_s4 + $0x24] ss:$16 sps:$4 sm:$0x1f]   ;;  %v195_v8 = vsel %vm194_vm5, 4294967295, %v1707_v2  ;;  %v1709_v21 = vmov 0  }
   0x4   :  { %v80_v5 = vand.u32 %v1544_v1, %v78_v4  ;;  %v196_v9 = vsel %vm75_vm1, %v195_v8, 0  ;;  %v1548_v10 = vld [vmem:[%s2234_s4 + $0x28] ss:$16 sps:$4 sm:$0x1f]   ;;  %v1552_v17 = vld [vmem:[%s2234_s4 + $0x4] ss:$16 sps:$4 sm:$0xff]   ;;  %241 = vmatprep.mubr.bf16.mxu1 %v1709_v21 }
   0x5   :  { %v201_v11 = vand.u32 %v1546_v7, %v196_v9  ;;  %v1550_v12 = vld [vmem:[%s2234_s4 + $0x2c] ss:$16 sps:$4 sm:$0x1f]   ;;  %v1551_v13 = vld [vmem:[%s2234_s4 + $0x20] ss:$16 sps:$4 sm:$0x1f]   ;;  %v204_v14 = vand.u32 %v1548_v10, %v196_v9 }
   0x6   :  { %1527 = vmatpush3.bf16.msra.mxu0 %v80_v5  ;;  %v207_v15 = vand.u32 %v1550_v12, %v196_v9  ;;  %v198_v16 = vand.u32 %v1551_v13, %v196_v9  ;;  %v1557_v19 = vld [vmem:[%s2234_s4] ss:$16 sps:$4 sm:$0xff]   ;;  %v1554_v20 = vld [vmem:[%s2234_s4 + $0x8] ss:$16 sps:$4 sm:$0xff]   ;;  %v1560_v22 = vld [vmem:[%s2235_s6 + $0x74] ss:$8 sps:$4 sm:$0xff]  }
   0x7   :  { %221 = vmatprep.subr.bf16.mxu1 %v201_v11  ;;  %v1563_v23 = vld [vmem:[%s2236_s8 + $0x74] ss:$8 sps:$4 sm:$0xff]   ;;  %v1369_v25 = vld [vmem:[%s2237_s3] ss:$0 sm:$0xff]  ;;  %vm190_vm6 = vcmask 203776   ;;  %vm1160_vm7 = vcmask 48128  }
   0x8   :  { %264 = vmatprep.subr.bf16.mxu0 %v207_v15  ;;  %222 = vmatpush1.bf16.msra.mxu1 %v198_v16  ;;  %v1558_v31 = vld [vmem:[%s2235_s6 + $0x70] ss:$8 sps:$4 sm:$0xff]   ;;  %v1566_v34 = vld [vmem:[%s2235_s6 + $0x64] ss:$8 sps:$4 sm:$0xff]   ;;  %v1564_v36 = vld [vmem:[%s2235_s6 + $0x60] ss:$8 sps:$4 sm:$0xff]  }
   0x9   :  { %1529 = vmatmul.mubr.msk.bf16.vlgmr.msra.gmra.mxu0 %vm71_vm4, %v1545_v6  ;;  %223 = vmatprep.subr.bf16.mxu1 %v1552_v17  ;;  %v1561_v32 = vld [vmem:[%s2236_s8 + $0x70] ss:$8 sps:$4 sm:$0xff]   ;;  %v1569_v35 = vld [vmem:[%s2236_s8 + $0x64] ss:$8 sps:$4 sm:$0xff]   ;;  %v1567_v37 = vld [vmem:[%s2236_s8 + $0x60] ss:$8 sps:$4 sm:$0xff]  }
   0xa   :  { %265 = vmatpush1.bf16.msra.mxu0 %v204_v14  ;;  %284 = vmatprep.mubr.bf16.mxu0 %v1709_v21  ;;  %v1572_v38 = vld [vmem:[%s2235_s6 + $0x54] ss:$8 sps:$4 sm:$0xff]   ;;  %v1570_v40 = vld [vmem:[%s2235_s6 + $0x50] ss:$8 sps:$4 sm:$0xff]   ;;  %v1578_v42 = vld [vmem:[%s2235_s6 + $0x44] ss:$8 sps:$4 sm:$0xff]  }
   0xb   :  { %266 = vmatprep.subr.bf16.mxu0 %v1556_v18  ;;  %v1575_v39 = vld [vmem:[%s2236_s8 + $0x54] ss:$8 sps:$4 sm:$0xff]   ;;  %v1573_v41 = vld [vmem:[%s2236_s8 + $0x50] ss:$8 sps:$4 sm:$0xff]   ;;  %v1581_v43 = vld [vmem:[%s2236_s8 + $0x44] ss:$8 sps:$4 sm:$0xff]  }
   0xc   :  { %224 = vmatpush1.bf16.msra.mxu1 %v1557_v19  ;;  %v1576_v44 = vld [vmem:[%s2235_s6 + $0x40] ss:$8 sps:$4 sm:$0xff]   ;;  %v1584_v46 = vld [vmem:[%s2235_s6 + $0x34] ss:$8 sps:$4 sm:$0xff]   ;;  %v1582_v48 = vld [vmem:[%s2235_s6 + $0x30] ss:$8 sps:$4 sm:$0xff]  }
   0xd   :  { %511 = vmatprep.subr.bf16.mxu1 %v1560_v22  ;;  %v1579_v45 = vld [vmem:[%s2236_s8 + $0x40] ss:$8 sps:$4 sm:$0xff]   ;;  %v1587_v47 = vld [vmem:[%s2236_s8 + $0x34] ss:$8 sps:$4 sm:$0xff]   ;;  %v1585_v49 = vld [vmem:[%s2236_s8 + $0x30] ss:$8 sps:$4 sm:$0xff]  }
   0xe   :  { %267 = vmatpush1.bf16.msra.mxu0 %v1554_v20  ;;  %v1590_v50 = vld [vmem:[%s2235_s6 + $0x24] ss:$8 sps:$4 sm:$0xff]   ;;  %v1588_v52 = vld [vmem:[%s2235_s6 + $0x20] ss:$8 sps:$4 sm:$0xff]   ;;  %v1596_v54 = vld [vmem:[%s2235_s6 + $0x14] ss:$8 sps:$4 sm:$0xff]  }
   0xf   :  { %762 = vmatprep.subr.bf16.mxu0 %v1563_v23  ;;  %v1593_v51 = vld [vmem:[%s2236_s8 + $0x24] ss:$8 sps:$4 sm:$0xff]   ;;  %v1591_v53 = vld [vmem:[%s2236_s8 + $0x20] ss:$8 sps:$4 sm:$0xff]   ;;  %v1599_v55 = vld [vmem:[%s2236_s8 + $0x14] ss:$8 sps:$4 sm:$0xff]  }
  0x10   :  { %v1594_v56 = vld [vmem:[%s2235_s6 + $0x10] ss:$8 sps:$4 sm:$0xff]   ;;  %v1602_v58 = vld [vmem:[%s2235_s6 + $0x4] ss:$8 sps:$4 sm:$0xff]   ;;  %v1600_v60 = vld [vmem:[%s2235_s6] ss:$8 sps:$4 sm:$0xff]  }
  0x11   :  { %v1597_v57 = vld [vmem:[%s2236_s8 + $0x10] ss:$8 sps:$4 sm:$0xff]   ;;  %v1605_v59 = vld [vmem:[%s2236_s8 + $0x4] ss:$8 sps:$4 sm:$0xff]   ;;  %v1603_v61 = vld [vmem:[%s2236_s8] ss:$8 sps:$4 sm:$0xff]  }
  0x12   :  { %v1608_v62 = vld [vmem:[%s2235_s6 + $0xf4] ss:$8 sps:$4 sm:$0xff]   ;;  %v1606_v0 = vld [vmem:[%s2235_s6 + $0xf0] ss:$8 sps:$4 sm:$0xff]   ;;  %v1614_v2 = vld [vmem:[%s2235_s6 + $0xe4] ss:$8 sps:$4 sm:$0xff]  }
  0x13   :  { %v1611_v63 = vld [vmem:[%s2236_s8 + $0xf4] ss:$8 sps:$4 sm:$0xff]   ;;  %v1609_v1 = vld [vmem:[%s2236_s8 + $0xf0] ss:$8 sps:$4 sm:$0xff]   ;;  %v1617_v3 = vld [vmem:[%s2236_s8 + $0xe4] ss:$8 sps:$4 sm:$0xff]  }
  0x14   :  { %v1612_v4 = vld [vmem:[%s2235_s6 + $0xe0] ss:$8 sps:$4 sm:$0xff]   ;;  %v1620_v6 = vld [vmem:[%s2235_s6 + $0xd4] ss:$8 sps:$4 sm:$0xff]   ;;  %v1618_v8 = vld [vmem:[%s2235_s6 + $0xd0] ss:$8 sps:$4 sm:$0xff]  }
  0x15   :  { %v1615_v5 = vld [vmem:[%s2236_s8 + $0xe0] ss:$8 sps:$4 sm:$0xff]   ;;  %v1623_v7 = vld [vmem:[%s2236_s8 + $0xd4] ss:$8 sps:$4 sm:$0xff]   ;;  %v1621_v9 = vld [vmem:[%s2236_s8 + $0xd0] ss:$8 sps:$4 sm:$0xff]  }
  0x16   :  { %v1626_v10 = vld [vmem:[%s2235_s6 + $0xc4] ss:$8 sps:$4 sm:$0xff]   ;;  %v1624_v12 = vld [vmem:[%s2235_s6 + $0xc0] ss:$8 sps:$4 sm:$0xff]   ;;  %v1632_v14 = vld [vmem:[%s2235_s6 + $0xb4] ss:$8 sps:$4 sm:$0xff]  }
  0x17   :  { %v1629_v11 = vld [vmem:[%s2236_s8 + $0xc4] ss:$8 sps:$4 sm:$0xff]   ;;  %v1627_v13 = vld [vmem:[%s2236_s8 + $0xc0] ss:$8 sps:$4 sm:$0xff]   ;;  %v1635_v15 = vld [vmem:[%s2236_s8 + $0xb4] ss:$8 sps:$4 sm:$0xff]  }
  0x18   :  { %v1630_v16 = vld [vmem:[%s2235_s6 + $0xb0] ss:$8 sps:$4 sm:$0xff]   ;;  %v1638_v18 = vld [vmem:[%s2235_s6 + $0xa4] ss:$8 sps:$4 sm:$0xff]   ;;  %v1636_v20 = vld [vmem:[%s2235_s6 + $0xa0] ss:$8 sps:$4 sm:$0xff]  }
  0x19   :  { %v1633_v17 = vld [vmem:[%s2236_s8 + $0xb0] ss:$8 sps:$4 sm:$0xff]   ;;  %v1641_v19 = vld [vmem:[%s2236_s8 + $0xa4] ss:$8 sps:$4 sm:$0xff]   ;;  %v1639_v21 = vld [vmem:[%s2236_s8 + $0xa0] ss:$8 sps:$4 sm:$0xff]  }
  0x1a   :  { %v1644_v22 = vld [vmem:[%s2235_s6 + $0x94] ss:$8 sps:$4 sm:$0xff]   ;;  %s1714_s17 = smov 125   ;;  %s1716_s18 = smov 123   ;;  %vm1336_vm5 = vcmask 7168  }
  0x1b   :  { %v1647_v23 = vld [vmem:[%s2236_s8 + $0x94] ss:$8 sps:$4 sm:$0xff]   ;;  %s1717_s0 = smov 3  }
  0xc9   :  { %v116_v24 = vpop.f32.mrf.mxu0 }
  0xca   :  { %v117_v28 = vadd.f32 %v1369_v25, %v116_v24  ;;  %v1642_v24 = vld [vmem:[%s2235_s6 + $0x90] ss:$8 sps:$4 sm:$0xff]  }
  0xcb   :  { %v1530_v26 = vpop.f32.mrf.mxu0 }
  0xcc   :  { %v1650_v26 = vld [vmem:[%s2235_s6 + $0x84] ss:$8 sps:$4 sm:$0xff]  }
  0xcd   :  { %v119_v27 = vpop.f32.mrf.mxu0 }
  0xce   :  { %v120_v29 = vadd.f32 %v1369_v25, %v119_v27  ;;  %v1645_v25 = vld [vmem:[%s2236_s8 + $0x90] ss:$8 sps:$4 sm:$0xff]   ;;  %v1653_v27 = vld [vmem:[%s2236_s8 + $0x84] ss:$8 sps:$4 sm:$0xff]  }
  0xcf   :  { %v1531_v30 = vpop.f32.mrf.mxu0 }
  0xd0   :  { %v123_v33 = vpack.c.bf16 %v120_v29, %v117_v28  ;;  %v1648_v28 = vld [vmem:[%s2235_s6 + $0x80] ss:$8 sps:$4 sm:$0xff]   ;;  %v1654_v30 = vld [vmem:[%s2238_s10 + $0x78] sm:$0xff]   ;;  %s1713_s6 = smov 2  }
  0xd1   :  { %v1651_v29 = vld [vmem:[%s2236_s8 + $0x80] ss:$8 sps:$4 sm:$0xff]  }
  0xd2   :  { %1381 = vmatmul.mubr.msk.bf16.vlgmr.msra.gmra.mxu1 %vm190_vm6, %v123_v33  ;;  %1382 = vmatmul.mubr.msk.bf16.vlgmr.msra.gmra.mxu0 %vm190_vm6, %v123_v33  ;;  %vm1339_vm6 = vcmask 15360  }
  0xd3   :  { %512 = vmatpush1.bf16.msra.mxu1 %v1558_v31  ;;  %763 = vmatpush1.bf16.msra.mxu0 %v1561_v32  ;;  %v1655_v31 = vld [vmem:[%s2238_s10 + $0xf8] sm:$0xff]   ;;  %v134_v32 = vlaneseq }
  0xd4   :  { %513 = vmatprep.subr.bf16.mxu1 %v1566_v34  ;;  %764 = vmatprep.subr.bf16.mxu0 %v1569_v35 }
  0xd5   :  { %v135_v33 = vshrl.u32 %v134_v32, 7  ;;  %v1681_v32 = vld [vmem:[%s2238_s10 + $0x88] sm:$0xff]  }
  0xd7   :  { %514 = vmatpush1.bf16.msra.mxu1 %v1564_v36  ;;  %765 = vmatpush1.bf16.msra.mxu0 %v1567_v37  ;;  %v2025_v34 = vsub.s32 1, %v135_v33  ;;  %v148_v35 = vsub.s32 3, %v135_v33  ;;  %v2027_v36 = vsub.s32 0, %v135_v33  ;;  %v144_v37 = vsub.s32 2, %v135_v33  ;;  %v1682_v33 = vld [vmem:[%s2238_s10 + $0x40] sm:$0xff]  }
  0xd8   :  { %515 = vmatprep.subr.bf16.mxu1 %v1572_v38  ;;  %766 = vmatprep.subr.bf16.mxu0 %v1575_v39  ;;  %v132_v38 = vld [vmem:[%s2239_s5] sm:$0xf] }
  0xdb   :  { %516 = vmatpush1.bf16.msra.mxu1 %v1570_v40  ;;  %767 = vmatpush1.bf16.msra.mxu0 %v1573_v41  ;;  %v141_v41 = vrot.slane %v132_v38, %v2025_v34 }
  0xdc   :  { %517 = vmatprep.subr.bf16.mxu1 %v1578_v42  ;;  %768 = vmatprep.subr.bf16.mxu0 %v1581_v43  ;;  %v149_v42 = vrot.slane %v132_v38, %v148_v35  ;;  %v137_v43 = vrot.slane %v132_v38, %v2027_v36  ;;  %v1683_v35 = vld [vmem:[%s2238_s10 + $0xc0] sm:$0xff]  }
  0xdf   :  { %518 = vmatpush1.bf16.msra.mxu1 %v1576_v44  ;;  %769 = vmatpush1.bf16.msra.mxu0 %v1579_v45  ;;  %v145_v44 = vrot.slane %v132_v38, %v144_v37  ;;  %v1684_v37 = vld [vmem:[%s2238_s10] sm:$0xff]  }
  0xe0   :  { %519 = vmatprep.subr.bf16.mxu1 %v1584_v46  ;;  %770 = vmatprep.subr.bf16.mxu0 %v1587_v47  ;;  %v1685_v38 = vld [vmem:[%s2238_s10 + $0x80] sm:$0xff]  }
  0xe3   :  { %520 = vmatpush1.bf16.msra.mxu1 %v1582_v48  ;;  %771 = vmatpush1.bf16.msra.mxu0 %v1585_v49 }
  0xe4   :  { %521 = vmatprep.subr.bf16.mxu1 %v1590_v50  ;;  %772 = vmatprep.subr.bf16.mxu0 %v1593_v51 }
  0xe7   :  { %522 = vmatpush1.bf16.msra.mxu1 %v1588_v52  ;;  %773 = vmatpush1.bf16.msra.mxu0 %v1591_v53 }
  0xe8   :  { %523 = vmatprep.subr.bf16.mxu1 %v1596_v54  ;;  %774 = vmatprep.subr.bf16.mxu0 %v1599_v55 }
  0xeb   :  { %524 = vmatpush1.bf16.msra.mxu1 %v1594_v56  ;;  %775 = vmatpush1.bf16.msra.mxu0 %v1597_v57 }
  0xec   :  { %525 = vmatprep.subr.bf16.mxu1 %v1602_v58  ;;  %776 = vmatprep.subr.bf16.mxu0 %v1605_v59 }
  0xef   :  { %526 = vmatpush1.bf16.msra.mxu1 %v1600_v60  ;;  %777 = vmatpush1.bf16.msra.mxu0 %v1603_v61 }
  0xf0   :  { %527 = vmatprep.subr.bf16.mxu1 %v1608_v62  ;;  %778 = vmatprep.subr.bf16.mxu0 %v1611_v63 }
  0xf3   :  { %528 = vmatpush2.bf16.msra.mxu1 %v1606_v0  ;;  %779 = vmatpush2.bf16.msra.mxu0 %v1609_v1 }
  0xf4   :  { %529 = vmatprep.subr.bf16.mxu1 %v1614_v2  ;;  %780 = vmatprep.subr.bf16.mxu0 %v1617_v3 }
  0xf7   :  { %530 = vmatpush2.bf16.msra.mxu1 %v1612_v4  ;;  %781 = vmatpush2.bf16.msra.mxu0 %v1615_v5  ;;  %v1656_v5 = vld [vmem:[%s2238_s10 + $0x38] sm:$0xff]  }
  0xf8   :  { %531 = vmatprep.subr.bf16.mxu1 %v1620_v6  ;;  %782 = vmatprep.subr.bf16.mxu0 %v1623_v7  ;;  %v1657_v6 = vld [vmem:[%s2238_s10 + $0xb8] sm:$0xff]  }
  0xfb   :  { %532 = vmatpush2.bf16.msra.mxu1 %v1618_v8  ;;  %783 = vmatpush2.bf16.msra.mxu0 %v1621_v9  ;;  %v1658_v9 = vld [vmem:[%s2238_s10 + $0x70] sm:$0xff]  }
  0xfc   :  { %533 = vmatprep.subr.bf16.mxu1 %v1626_v10  ;;  %784 = vmatprep.subr.bf16.mxu0 %v1629_v11  ;;  %v1659_v10 = vld [vmem:[%s2238_s10 + $0xf0] sm:$0xff]  }
  0xfd   :  { %v1660_v11 = vld [vmem:[%s2238_s10 + $0x30] sm:$0xff]  }
  0xff   :  { %534 = vmatpush2.bf16.msra.mxu1 %v1624_v12  ;;  %785 = vmatpush2.bf16.msra.mxu0 %v1627_v13  ;;  %v1661_v12 = vld [vmem:[%s2238_s10 + $0xb0] sm:$0xff]   ;;  %v1662_v13 = vld [vmem:[%s2238_s10 + $0x68] sm:$0xff]  }
 0x100   :  { %535 = vmatprep.subr.bf16.mxu1 %v1632_v14  ;;  %786 = vmatprep.subr.bf16.mxu0 %v1635_v15  ;;  %v1663_v14 = vld [vmem:[%s2238_s10 + $0xe8] sm:$0xff]  }
 0x101   :  { %v1664_v15 = vld [vmem:[%s2238_s10 + $0x28] sm:$0xff]  }
 0x103   :  { %536 = vmatpush2.bf16.msra.mxu1 %v1630_v16  ;;  %787 = vmatpush2.bf16.msra.mxu0 %v1633_v17  ;;  %v1665_v16 = vld [vmem:[%s2238_s10 + $0xa8] sm:$0xff]   ;;  %v1666_v17 = vld [vmem:[%s2238_s10 + $0x60] sm:$0xff]  }
 0x104   :  { %537 = vmatprep.subr.bf16.mxu1 %v1638_v18  ;;  %788 = vmatprep.subr.bf16.mxu0 %v1641_v19  ;;  %v1667_v18 = vld [vmem:[%s2238_s10 + $0xe0] sm:$0xff]  }
 0x105   :  { %v1668_v19 = vld [vmem:[%s2238_s10 + $0x20] sm:$0xff]  }
 0x107   :  { %538 = vmatpush2.bf16.msra.mxu1 %v1636_v20  ;;  %789 = vmatpush2.bf16.msra.mxu0 %v1639_v21  ;;  %v1669_v20 = vld [vmem:[%s2238_s10 + $0xa0] sm:$0xff]   ;;  %v1670_v21 = vld [vmem:[%s2238_s10 + $0x58] sm:$0xff]  }
 0x108   :  { %539 = vmatprep.subr.bf16.mxu1 %v1644_v22  ;;  %790 = vmatprep.subr.bf16.mxu0 %v1647_v23  ;;  %v1671_v22 = vld [vmem:[%s2238_s10 + $0xd8] sm:$0xff]  }
 0x109   :  { %v1672_v23 = vld [vmem:[%s2238_s10 + $0x18] sm:$0xff]  }
 0x10b   :  { %540 = vmatpush2.bf16.msra.mxu1 %v1642_v24  ;;  %791 = vmatpush2.bf16.msra.mxu0 %v1645_v25  ;;  %v1673_v24 = vld [vmem:[%s2238_s10 + $0x98] sm:$0xff]   ;;  %v1674_v25 = vld [vmem:[%s2238_s10 + $0x50] sm:$0xff]  }
 0x10c   :  { %541 = vmatprep.subr.bf16.mxu1 %v1650_v26  ;;  %792 = vmatprep.subr.bf16.mxu0 %v1653_v27  ;;  %v1675_v26 = vld [vmem:[%s2238_s10 + $0xd0] sm:$0xff]  }
 0x10d   :  { %v1676_v27 = vld [vmem:[%s2238_s10 + $0x10] sm:$0xff]  }
 0x10f   :  { %542 = vmatpush2.bf16.msra.mxu1 %v1648_v28  ;;  %793 = vmatpush2.bf16.msra.mxu0 %v1651_v29  ;;  %v1677_v28 = vld [vmem:[%s2238_s10 + $0x90] sm:$0xff]   ;;  %v1678_v29 = vld [vmem:[%s2238_s10 + $0x48] sm:$0xff]  }
 0x110   :  { %1482 = vmatprep.subr.bf16.mxu1 %v1654_v30  ;;  %1504 = vmatprep.subr.bf16.mxu0 %v1655_v31  ;;  %v1679_v30 = vld [vmem:[%s2238_s10 + $0xc8] sm:$0xff]  }
 0x111   :  { %v1680_v31 = vld [vmem:[%s2238_s10 + $0x8] sm:$0xff]  }
 0x192   :  { %v243_v39 = vpop.f32.mrf.mxu1  ;;  %v286_v40 = vpop.f32.mrf.mxu0 }
 0x193   :  { %v244_v53 = vadd.f32 %v243_v39, %v137_v43  ;;  %v287_v54 = vadd.f32 %v286_v40, %v145_v44  ;;  %v339_v39 = vld [vmem:[%s2240_s7] sm:$0x3] }
 0x194   :  { %v245_v45 = vpop.f32.mrf.mxu1  ;;  %v288_v46 = vpop.f32.mrf.mxu0  ;;  %v590_v40 = vld [vmem:[%s2241_s9] sm:$0x3] }
 0x195   :  { %v246_v49 = vadd.f32 %v245_v45, %v141_v41  ;;  %v289_v50 = vadd.f32 %v288_v46, %v149_v42  ;;  %v295_v1 = vmax.f32 %v244_v53, 0.0  ;;  %v297_v2 = vmax.f32 %v287_v54, 0.0 }
 0x196   :  { %v247_v47 = vpop.f32.mrf.mxu1  ;;  %v290_v48 = vpop.f32.mrf.mxu0  ;;  %v344_v45 = vrot.slane %v339_v39, %v2027_v36  ;;  %v595_v46 = vrot.slane %v590_v40, %v2027_v36 }
 0x197   :  { %v248_v51 = vadd.f32 %v247_v47, %v137_v43  ;;  %v291_v52 = vadd.f32 %v290_v48, %v145_v44  ;;  %v296_v61 = vmax.f32 %v246_v49, 0.0  ;;  %v298_v62 = vmax.f32 %v289_v50, 0.0 }
 0x198   :  { %v249_v55 = vpop.f32.mrf.mxu1  ;;  %v292_v56 = vpop.f32.mrf.mxu0  ;;  %v348_v43 = vrot.slane %v339_v39, %v2025_v34  ;;  %v599_v44 = vrot.slane %v590_v40, %v2025_v34 }
 0x199   :  { %v250_v57 = vadd.f32 %v249_v55, %v141_v41  ;;  %v293_v58 = vadd.f32 %v292_v56, %v149_v42  ;;  %v299_v59 = vmax.f32 %v248_v51, 0.0  ;;  %v301_v60 = vmax.f32 %v291_v52, 0.0 }
 0x19b   :  { %v300_v63 = vmax.f32 %v250_v57, 0.0  ;;  %v302_v0 = vmax.f32 %v293_v58, 0.0  ;;  %v303_v7 = vpack.c.bf16 %v299_v59, %v295_v1  ;;  %v305_v8 = vpack.c.bf16 %v301_v60, %v297_v2 }
 0x19d   :  { %v304_v3 = vpack.c.bf16 %v300_v63, %v296_v61  ;;  %v306_v4 = vpack.c.bf16 %v302_v0, %v298_v62 }
 0x19f   :  { %543 = vmatprep.mubr.bf16.mxu1 %v304_v3  ;;  %794 = vmatprep.mubr.bf16.mxu0 %v306_v4 }
 0x1a0   :  { %544 = vmatmul.mubr.bf16.vlgmr.msra.gmra.mxu1 %v303_v7  ;;  %795 = vmatmul.mubr.bf16.vlgmr.msra.gmra.mxu0 %v305_v8 }
 0x1a1   :  { %1483 = vmatpush3.bf16.msra.mxu1 %v1656_v5  ;;  %1505 = vmatpush3.bf16.msra.mxu0 %v1657_v6 }
 0x1a2   :  { %1484 = vmatprep.subr.bf16.mxu1 %v1658_v9  ;;  %1506 = vmatprep.subr.bf16.mxu0 %v1659_v10  ;;  %v1447_v9 = vld [vmem:[%s2242_s11] ss:$0 sm:$0xff] }
 0x1a5   :  { %1485 = vmatpush3.bf16.msra.mxu1 %v1660_v11  ;;  %1507 = vmatpush3.bf16.msra.mxu0 %v1661_v12 }
 0x1a6   :  { %1486 = vmatprep.subr.bf16.mxu1 %v1662_v13  ;;  %1508 = vmatprep.subr.bf16.mxu0 %v1663_v14 }
 0x1a9   :  { %1487 = vmatpush3.bf16.msra.mxu1 %v1664_v15  ;;  %1509 = vmatpush3.bf16.msra.mxu0 %v1665_v16 }
 0x1aa   :  { %1488 = vmatprep.subr.bf16.mxu1 %v1666_v17  ;;  %1510 = vmatprep.subr.bf16.mxu0 %v1667_v18 }
 0x1ad   :  { %1489 = vmatpush3.bf16.msra.mxu1 %v1668_v19  ;;  %1511 = vmatpush3.bf16.msra.mxu0 %v1669_v20 }
 0x1ae   :  { %1490 = vmatprep.subr.bf16.mxu1 %v1670_v21  ;;  %1512 = vmatprep.subr.bf16.mxu0 %v1671_v22 }
 0x1b1   :  { %1491 = vmatpush3.bf16.msra.mxu1 %v1672_v23  ;;  %1513 = vmatpush3.bf16.msra.mxu0 %v1673_v24 }
 0x1b2   :  { %1492 = vmatprep.subr.bf16.mxu1 %v1674_v25  ;;  %1514 = vmatprep.subr.bf16.mxu0 %v1675_v26  ;;  %v1163_v26 = vld [vmem:[%s2244_s1] sm:$0xff] }
 0x1b3   :  { %vm1165_vm8 = vcmp.ge.s32.totalorder %v1163_v26, 0  ;;  %vm1167_vm9 = vcmp.le.s32.totalorder %v1163_v26, 2 }
 0x1b4   :  { %vm1169_vm10 = vmand %vm1165_vm8, %vm1167_vm9  ;;  %vm1348_vm8 = vcmask 31744  }
 0x1b5   :  { %1493 = vmatpush3.bf16.msra.mxu1 %v1676_v27  ;;  %1515 = vmatpush3.bf16.msra.mxu0 %v1677_v28  ;;  %v2160_v27 = vsel %vm1169_vm10, %v1163_v26, 0 }
 0x1b6   :  { %1494 = vmatprep.subr.bf16.mxu1 %v1678_v29  ;;  %1516 = vmatprep.subr.bf16.mxu0 %v1679_v30  ;;  %vm1251_vm11 = vcmp.eq.s32.totalorder %v2160_v27, 0  ;;  %vm1257_vm12 = vcmp.eq.s32.totalorder %v2160_v27, 1  ;;  %vm1263_vm13 = vcmp.eq.s32.totalorder %v2160_v27, 2 }
 0x1b9   :  { %1495 = vmatpush3.bf16.msra.mxu1 %v1680_v31  ;;  %1517 = vmatpush3.bf16.msra.mxu0 %v1681_v32 }
 0x1ba   :  { %1496 = vmatprep.subr.bf16.mxu1 %v1682_v33  ;;  %1518 = vmatprep.subr.bf16.mxu0 %v1683_v35 }
 0x1bd   :  { %1497 = vmatpush3.bf16.msra.mxu1 %v1684_v37  ;;  %1519 = vmatpush3.bf16.msra.mxu0 %v1685_v38 }
 0x260   :  { %v545_v41 = vpop.f32.mrf.mxu1  ;;  %v796_v42 = vpop.f32.mrf.mxu0 }
 0x261   :  { %v546_v55 = vadd.f32 %v545_v41, %v344_v45  ;;  %v797_v56 = vadd.f32 %v796_v42, %v595_v46 }
 0x262   :  { %v547_v47 = vpop.f32.mrf.mxu1  ;;  %v798_v48 = vpop.f32.mrf.mxu0 }
 0x263   :  { %v548_v51 = vadd.f32 %v547_v47, %v348_v43  ;;  %v799_v52 = vadd.f32 %v798_v48, %v599_v44  ;;  %v554_v1 = vmax.f32 %v546_v55, 0.0  ;;  %v805_v2 = vmax.f32 %v797_v56, 0.0  ;;  %v1164_v56 = vld [vmem:[%s2244_s1 + $0x8] sm:$0xff]  ;;  %s1715_s1 = smov 124  }
 0x264   :  { %v549_v49 = vpop.f32.mrf.mxu1  ;;  %v800_v50 = vpop.f32.mrf.mxu0  ;;  %vm1166_vm14 = vcmp.ge.s32.totalorder %v1164_v56, 0  ;;  %vm1168_vm15 = vcmp.le.s32.totalorder %v1164_v56, 2 }
 0x265   :  { %v550_v53 = vadd.f32 %v549_v49, %v344_v45  ;;  %v801_v54 = vadd.f32 %v800_v50, %v595_v46  ;;  %v555_v62 = vmax.f32 %v548_v51, 0.0  ;;  %v806_v63 = vmax.f32 %v799_v52, 0.0  ;;  %vm1170_vm1 = vmand %vm1166_vm14, %vm1168_vm15 }
 0x266   :  { %v551_v57 = vpop.f32.mrf.mxu1  ;;  %v802_v58 = vpop.f32.mrf.mxu0 }
 0x267   :  { %v552_v59 = vadd.f32 %v551_v57, %v348_v43  ;;  %v803_v60 = vadd.f32 %v802_v58, %v599_v44  ;;  %v556_v61 = vmax.f32 %v550_v53, 0.0  ;;  %v807_v34 = vmax.f32 %v801_v54, 0.0 }
 0x269   :  { %v557_v0 = vmax.f32 %v552_v59, 0.0  ;;  %v808_v36 = vmax.f32 %v803_v60, 0.0  ;;  %v809_v5 = vpack.c.bf16 %v556_v61, %v554_v1  ;;  %v811_v6 = vpack.c.bf16 %v807_v34, %v805_v2 }
 0x26a   :  { %v1172_v60 = vsel %vm1170_vm1, %v1164_v56, 0 }
 0x26b   :  { %v810_v3 = vpack.c.bf16 %v557_v0, %v555_v62  ;;  %v812_v4 = vpack.c.bf16 %v808_v36, %v806_v63  ;;  %vm1258_vm2 = vcmp.eq.s32.totalorder %v1172_v60, 1  ;;  %vm1252_vm3 = vcmp.eq.s32.totalorder %v1172_v60, 0 }
 0x26c   :  { %vm1264_vm4 = vcmp.eq.s32.totalorder %v1172_v60, 2 }
 0x26d   :  { %1108 = vmatprep.mubr.bf16.mxu1 %v810_v3  ;;  %1149 = vmatprep.mubr.bf16.mxu0 %v812_v4 }
 0x26e   :  { %1109 = vmatmul.mubr.bf16.vlgmr.msra.gmra.mxu1 %v809_v5  ;;  %1150 = vmatmul.mubr.bf16.vlgmr.msra.gmra.mxu0 %v811_v6 }
 0x32e   :  { %v1498_v7 = vpop.f32.mrf.mxu1  ;;  %v1520_v8 = vpop.f32.mrf.mxu0 }
 0x330   :  { %v1499_v10 = vpop.f32.mrf.mxu1  ;;  %v1521_v11 = vpop.f32.mrf.mxu0 }
 0x331   :  { %v1500_v12 = vadd.f32 %v1499_v10, %v1498_v7  ;;  %v1522_v16 = vadd.f32 %v1521_v11, %v1520_v8 }
 0x332   :  { %v1501_v13 = vpop.f32.mrf.mxu1  ;;  %v1523_v14 = vpop.f32.mrf.mxu0 }
 0x333   :  { %v1111_v15 = vadd.f32 %v1500_v12, %v1447_v9 }
 0x334   :  { %v1502_v17 = vpop.f32.mrf.mxu1  ;;  %v1524_v18 = vpop.f32.mrf.mxu0 }
 0x335   :  { %v1152_v19 = vadd.f32 %v1522_v16, %v1111_v15  ;;  %v1503_v20 = vadd.f32 %v1502_v17, %v1501_v13  ;;  %v1525_v22 = vadd.f32 %v1524_v18, %v1523_v14 }
 0x337   :  { %1686 = vtanh.f32 %v1152_v19  ;;  %v1114_v21 = vadd.f32 %v1503_v20, %v1447_v9 }
 0x339   :  { %v1155_v23 = vadd.f32 %v1525_v22, %v1114_v21 }
 0x33b   :  { %1688 = vtanh.f32 %v1155_v23 }
 0x344   :  { %v2137_v24 = vpop.eup %1686 }
 0x345   :  { %1161 = vst.msk [vmem:[%s2243_s12] sm:$0xff] %vm1160_vm7, %v2137_v24  ;;  %1183 = vrot.lane.b32.xlu1 %v2137_v24, %s1710_s30  ;;  %1175 = vrot.lane.b32.xlu0 %v2137_v24, %s1711_s14  ;;  %v1253_v31 = vsel %vm1251_vm11, %v2137_v24, 0.0 }
 0x348   :  { %v2147_v25 = vpop.eup %1688 }
 0x349   :  { %1162 = vst.msk [vmem:[%s2243_s12 + $0x8] sm:$0xff] %vm1160_vm7, %v2147_v25  ;;  %1185 = vrot.lane.b32.xlu1 %v2147_v25, %s1710_s30  ;;  %1177 = vrot.lane.b32.xlu0 %v2147_v25, %s1711_s14  ;;  %s1712_s12 = smov 1   ;;  %v1254_v34 = vsel %vm1252_vm3, %v2147_v25, 0.0  ;;  %vm1342_vm7 = vcmask 23552  }
 0x3b7   :  { %v1184_v28 = vpop.permute.xlu1 %1183  ;;  %v1176_v29 = vpop.permute.xlu0 %1175 }
 0x3b8   :  { %v1181_v30 = vmax.f32 %v2137_v24, %v1176_v29  ;;  %v1259_v32 = vsel %vm1257_vm12, %v1176_v29, 0.0  ;;  %v1265_v35 = vsel %vm1263_vm13, %v1184_v28, 0.0 }
 0x3b9   :  { %v1261_v33 = vadd.f32 %v1259_v32, %v1253_v31 }
 0x3ba   :  { %v2173_v37 = vmax.f32 %v1181_v30, %v1184_v28 }
 0x3bb   :  { %v1178_v38 = vpop.permute.xlu0 %1177  ;;  %v1267_v39 = vadd.f32 %v1265_v35, %v1261_v33  ;;  %v1186_v41 = vpop.permute.xlu1 %1185 }
 0x3bc   :  { %v1182_v40 = vmax.f32 %v2147_v25, %v1178_v38  ;;  %1201 = vrot.lane.b32.xlu0 %v2173_v37, %s1712_s12  ;;  %v1260_v61 = vsel %vm1258_vm2, %v1178_v38, 0.0  ;;  %v1266_v63 = vsel %vm1264_vm4, %v1186_v41, 0.0  ;;  %v1191_v36 = vsub.f32 %v2137_v24, %v2173_v37 }
 0x3bd   :  { %v1262_v62 = vadd.f32 %v1260_v61, %v1254_v34 }
 0x3be   :  { %v2178_v42 = vmax.f32 %v1182_v40, %v1186_v41  ;;  %v1193_v2 = vmul.f32 1.442695, %v1191_v36 }
 0x3bf   :  { %v1268_v0 = vadd.f32 %v1266_v63, %v1262_v62 }
 0x3c0   :  { %1223 = vrot.lane.b32.xlu0 %v2173_v37, %s1713_s6  ;;  %1203 = vrot.lane.b32.xlu1 %v2178_v42, %s1712_s12  ;;  %v1192_v1 = vsub.f32 %v2147_v25, %v2178_v42 }
 0x3c2   :  { %v1195_v3 = vmul.f32 1.442695, %v1192_v1 }
 0x3c4   :  { %1225 = vrot.lane.b32.xlu1 %v2178_v42, %s1713_s6 }
 0x42e   :  { %v1202_v43 = vpop.permute.xlu0 %1201 }
 0x42f   :  { %v1207_v44 = vsub.f32 %v2137_v24, %v1202_v43 }
 0x431   :  { %v1209_v45 = vmul.f32 1.442695, %v1207_v44 }
 0x432   :  { %v1204_v46 = vpop.permute.xlu1 %1203  ;;  %v1224_v47 = vpop.permute.xlu0 %1223 }
 0x433   :  { %1690 = vpow2.f32 %v1209_v45  ;;  %v1208_v48 = vsub.f32 %v2147_v25, %v1204_v46  ;;  %v1229_v49 = vsub.f32 %v2137_v24, %v1224_v47 }
 0x435   :  { %v1211_v50 = vmul.f32 1.442695, %v1208_v48  ;;  %v1231_v51 = vmul.f32 1.442695, %v1229_v49 }
 0x436   :  { %v1226_v52 = vpop.permute.xlu1 %1225 }
 0x437   :  { %1692 = vpow2.f32 %v1211_v50  ;;  %v1230_v53 = vsub.f32 %v2147_v25, %v1226_v52 }
 0x438   :  { %1694 = vpow2.f32 %v1231_v51 }
 0x439   :  { %v1233_v54 = vmul.f32 1.442695, %v1230_v53 }
 0x43b   :  { %1696 = vpow2.f32 %v1233_v54 }
 0x43c   :  { %1698 = vpow2.f32 %v1193_v2 }
 0x43d   :  { %1700 = vpow2.f32 %v1195_v3 }
 0x440   :  { %v1691_v55 = vpop.eup %1690 }
 0x441   :  { %1215 = vrot.lane.b32.xlu0 %v1691_v55, %s1711_s14 }
 0x444   :  { %v1693_v57 = vpop.eup %1692 }
 0x445   :  { %v1695_v58 = vpop.eup %1694  ;;  %1217 = vrot.lane.b32.xlu1 %v1693_v57, %s1711_s14 }
 0x446   :  { %1237 = vrot.lane.b32.xlu0 %v1695_v58, %s1710_s30  ;;  %v1347_v58 = vld [vmem:[%s2231_s13] sm:$0x1] }
 0x448   :  { %v1697_v59 = vpop.eup %1696 }
 0x449   :  { %1239 = vrot.lane.b32.xlu1 %v1697_v59, %s1710_s30  ;;  %v1699_v5 = vpop.eup %1698 }
 0x44a   :  { %1269 = vrot.lane.b32.xlu0 %v2137_v24, %s1714_s17  ;;  %v1701_v9 = vpop.eup %1700 }
 0x44d   :  { %1271 = vrot.lane.b32.xlu1 %v2147_v25, %s1714_s17 }
 0x44e   :  { %1279 = vrot.lane.b32.xlu0 %v2137_v24, %s1715_s1 }
 0x451   :  { %1281 = vrot.lane.b32.xlu1 %v2147_v25, %s1715_s1 }
 0x452   :  { %1289 = vrot.lane.b32.xlu0 %v2137_v24, %s1716_s18 }
 0x455   :  { %1291 = vrot.lane.b32.xlu1 %v2147_v25, %s1716_s18 }
 0x456   :  { %1314 = vrot.lane.b32.xlu0 %v1267_v39, %s1712_s12 }
 0x459   :  { %1316 = vrot.lane.b32.xlu1 %v1268_v0, %s1712_s12 }
 0x4b3   :  { %v1216_v4 = vpop.permute.xlu0 %1215 }
 0x4b4   :  { %v1221_v6 = vadd.f32 %v1699_v5, %v1216_v4 }
 0x4b7   :  { %v1218_v7 = vpop.permute.xlu1 %1217 }
 0x4b8   :  { %v1238_v8 = vpop.permute.xlu0 %1237  ;;  %v1222_v11 = vadd.f32 %v1701_v9, %v1218_v7 }
 0x4b9   :  { %v1243_v10 = vadd.f32 %v1238_v8, %v1221_v6 }
 0x4bb   :  { %1702 = vlog2.f32 %v1243_v10  ;;  %v1240_v12 = vpop.permute.xlu1 %1239 }
 0x4bc   :  { %v1244_v13 = vadd.f32 %v1240_v12, %v1222_v11  ;;  %v1270_v14 = vpop.permute.xlu0 %1269 }
 0x4bd   :  { %v1275_v25 = vsel %vm1251_vm11, %v1270_v14, 0.0 }
 0x4be   :  { %1704 = vlog2.f32 %v1244_v13 }
 0x4bf   :  { %v1272_v15 = vpop.permute.xlu1 %1271 }
 0x4c0   :  { %v1280_v16 = vpop.permute.xlu0 %1279  ;;  %v1276_v32 = vsel %vm1252_vm3, %v1272_v15, 0.0 }
 0x4c1   :  { %v1285_v21 = vsel %vm1257_vm12, %v1280_v16, 0.0 }
 0x4c2   :  { %v1287_v29 = vadd.f32 %v1285_v21, %v1275_v25 }
 0x4c3   :  { %v1282_v17 = vpop.permute.xlu1 %1281 }
 0x4c4   :  { %v1290_v20 = vpop.permute.xlu0 %1289  ;;  %v1286_v30 = vsel %vm1258_vm2, %v1282_v17, 0.0 }
 0x4c5   :  { %v1295_v26 = vsel %vm1263_vm13, %v1290_v20, 0.0 }
 0x4c6   :  { %v1297_v33 = vadd.f32 %v1295_v26, %v1287_v29 }
 0x4c7   :  { %v1292_v28 = vpop.permute.xlu1 %1291 }
 0x4c8   :  { %v1703_v18 = vpop.eup %1702  ;;  %v1296_v35 = vsel %vm1264_vm4, %v1292_v28, 0.0  ;;  %v1315_v38 = vpop.permute.xlu0 %1314 }
 0x4c9   :  { %v1246_v19 = vmul.f32 0.6931472, %v1703_v18 }
 0x4cb   :  { %v1705_v22 = vpop.eup %1704  ;;  %v1249_v23 = vadd.f32 %v1246_v19, %v2173_v37  ;;  %v1288_v37 = vadd.f32 %v1286_v30, %v1276_v32  ;;  %v1317_v39 = vpop.permute.xlu1 %1316 }
 0x4cc   :  { %v1248_v24 = vmul.f32 0.6931472, %v1705_v22 }
 0x4cd   :  { %1322 = vrot.lane.b32.xlu0 %v1249_v23, %s1711_s14  ;;  %v1298_v27 = vadd.f32 %v1296_v35, %v1288_v37 }
 0x4ce   :  { %v1250_v31 = vadd.f32 %v1248_v24, %v2178_v42  ;;  %v1337_v42 = vsel %vm1336_vm5, %v1249_v23, %v1315_v38 }
 0x4d0   :  { %1324 = vrot.lane.b32.xlu1 %v1250_v31, %s1711_s14  ;;  %v1338_v45 = vsel %vm1336_vm5, %v1250_v31, %v1317_v39 }
 0x4d1   :  { %1330 = vrot.lane.b32.xlu0 %v1297_v33, %s1717_s0 }
 0x4d4   :  { %1332 = vrot.lane.b32.xlu1 %v1298_v27, %s1717_s0 }
 0x53f   :  { %v1323_v40 = vpop.permute.xlu0 %1322 }
 0x540   :  { %v1340_v44 = vsel %vm1339_vm6, %v1337_v42, %v1323_v40 }
 0x542   :  { %v1325_v41 = vpop.permute.xlu1 %1324 }
 0x543   :  { %v1331_v43 = vpop.permute.xlu0 %1330  ;;  %v1341_v47 = vsel %vm1339_vm6, %v1338_v45, %v1325_v41 }
 0x544   :  { %v1343_v46 = vsel %vm1342_vm7, %v1340_v44, %v1331_v43 }
 0x545   :  { %v1349_v50 = vsel %vm1348_vm8, %v1343_v46, 0.0 }
 0x546   :  { %v1333_v48 = vpop.permute.xlu1 %1332 }
 0x547   :  { %v1344_v49 = vsel %vm1342_vm7, %v1341_v47, %v1333_v48 }
 0x548   :  { %v1350_v51 = vsel %vm1348_vm8, %v1344_v49, 0.0 }
 0x549   :  { %v1351_v52 = vadd.f32 %v1350_v51, %v1349_v50 }
 0x54b   :  { %v1352_v53 = vrot.slane %v1351_v52, 4 }
 0x54d   :  { %v1353_v54 = vadd.f32 %v1352_v53, %v1351_v52 }
 0x54f   :  { %v1354_v55 = vrot.slane %v1353_v54, 2 }
 0x551   :  { %v1355_v56 = vadd.f32 %v1354_v55, %v1353_v54 }
 0x553   :  { %v1356_v57 = vrot.slane %v1355_v56, 1 }
 0x555   :  { %v1357_v59 = vadd.f32 %v1356_v57, %v1355_v56 }
 0x557   :  { %v1358_v60 = vadd.f32 %v1357_v59, %v1347_v58 }
 0x559   :  { %1360 = vst.msk [vmem:[%s2231_s13] sm:$0x1] %vm48_vm0, %v1358_v60 }

</bundles_post_ra>
